<compile_context>
chip_gen: v5e
topology: v5e:2x2
jax: 0.10.0
libtpu: 0.0.40
codegen_flags: <defaults>
</compile_context>

<pallas_src>
import jax
import jax.numpy as jnp
from jax.experimental import pallas as pl
from jax.experimental.pallas import tpu as pltpu


# ---------------------------------------------------------------------------
# Kernel: one (TM, C) logits tile per grid step.
#   x_ref:  (TM, H)  compute dtype (bf16 by default, f32 for strict parity)
#   wt_ref: (H,  C)  compute dtype, VMEM-resident across the whole grid
#   b_ref:  (1,  C)  f32 bias, VMEM-resident
#   o_ref:  (TM, C)  out dtype
# ---------------------------------------------------------------------------
def _linear_head_kernel(x_ref, wt_ref, b_ref, o_ref):
    acc = jnp.dot(x_ref[...], wt_ref[...], preferred_element_type=jnp.float32)
    o_ref[...] = (acc + b_ref[...]).astype(o_ref.dtype)


# ---------------------------------------------------------------------------
# One-time parameter packing (hoisted out of the per-call hot path)
# ---------------------------------------------------------------------------
def _round_up(v, m):
    return ((v + m - 1) // m) * m


def prepare_head_params(weight, bias, param_dtype=jnp.bfloat16):
    """Pack nn.Linear params for the Pallas head.

    weight: (C, H) PyTorch nn.Linear convention.
    bias:   (C,)
    param_dtype: streaming dtype for x/weight (bf16 default; f32 for strict parity).
    Returns (wt (H, C) in param_dtype, bias (1, C) f32).
    """
    C, H = weight.shape
    wt = jnp.asarray(weight.T, dtype=param_dtype)              # (H, C)
    b2d = jnp.asarray(bias, dtype=jnp.float32).reshape(1, C)   # f32 epilogue bias
    return wt, b2d


# ---------------------------------------------------------------------------
# Generation-aware VMEM budget & tile-row selection
# ---------------------------------------------------------------------------
def _vmem_budget_bytes():
    # ~half of physical VMEM, capped at 64 MiB:
    #   v5e/v6e: 128 MiB physical -> 64 MiB budget (default scoped limit is raised via
    #   vmem_limit_bytes);  v7x: 64 MiB per TC -> 32 MiB budget.
    try:
        cap = int(pltpu.get_tpu_info().vmem_capacity_bytes)
    except Exception:
        cap = 64 * 1024 * 1024  # conservative fallback (v7x per-TC physical)
    return int(min(cap // 2, 64 * 1024 * 1024))


def _choose_tm(M, H, C, x_item, w_item, o_item, align, budget_bytes):
    # Weight + bias stay resident in VMEM across the whole grid; budget them at 2x to
    # stay conservative about compiler buffering, plus ~2 MiB internal headroom.
    resident = 2 * (H * C * w_item + C * 4)
    headroom = 2 * 1024 * 1024
    avail = budget_bytes - resident - headroom
    if avail <= 0:
        # TODO(synk): stream the weight over an N (class) grid axis instead of raising.
        raise NotImplementedError(
            f"Head weight ({H}x{C}, {resident / 2**20:.1f} MiB double-buffered) does not"
            f" fit the {budget_bytes / 2**20:.1f} MiB VMEM budget; class-axis streaming"
            f" is required for this size.")
    per_row = 2 * (H * x_item + C * o_item)   # double-buffered x tile + out tile
    tm = max(align, (avail // per_row) // align * align)
    tm = min(tm, 8192)                        # amortizes ~0.35us/step overhead to noise
    m_pad = _round_up(M, align)
    tm = min(tm, m_pad)
    # Prefer >= 2 grid steps so the "parallel" M axis can actually split across the two
    # TensorCores on v7x (costs one extra ~0.35us step elsewhere — negligible).
    if m_pad >= 2 * align and pl.cdiv(m_pad, tm) < 2:
        tm = max(align, _round_up(pl.cdiv(m_pad, 2), align))
    return int(tm)


# ---------------------------------------------------------------------------
# Forward
# ---------------------------------------------------------------------------
def head_forward(x, wt, b2d, *, tm=None, out_dtype=None):
    """Pallas equivalent of Head.forward for Prediction in {'CTC', 'Linear'}.

    x:   (B, T, H)
    wt:  (H, C)  pre-transposed weight in the compute dtype (from prepare_head_params)
    b2d: (1, C)  f32 bias
    Returns (B, T, C) logits in out_dtype (default: x.dtype; pass jnp.bfloat16 to also
    halve the output writeback if downstream accepts bf16 logits).
    """
    B, T, H = x.shape
    Hw, C = wt.shape
    assert Hw == H, (Hw, H)
    M = B * T

    compute_dtype = wt.dtype
    if out_dtype is None:
        out_dtype = x.dtype
    x2d = x.reshape(M, H).astype(compute_dtype)   # no-op when x already matches

    x_item = jnp.dtype(compute_dtype).itemsize
    w_item = x_item
    o_item = jnp.dtype(out_dtype).itemsize
    align = 16 if x_item < 4 else 8               # bf16 sublane packing vs f32

    budget = _vmem_budget_bytes()
    if tm is None:
        tm = _choose_tm(M, H, C, x_item, w_item, o_item, align, budget)
    grid_m = pl.cdiv(M, tm)

    cost = pl.CostEstimate(
        flops=2 * M * H * C,
        transcendentals=0,
        bytes_accessed=M * H * x_item + H * C * w_item + C * 4 + M * C * o_item,
    )

    out = pl.pallas_call(
        _linear_head_kernel,
        out_shape=jax.ShapeDtypeStruct((M, C), out_dtype),
        grid_spec=pltpu.PrefetchScalarGridSpec(
            num_scalar_prefetch=0,
            grid=(grid_m,),
            in_specs=[
                pl.BlockSpec((tm, H), lambda i: (i, 0)),   # streamed x row-tiles
                pl.BlockSpec((H, C), lambda i: (0, 0)),    # weight: resident in VMEM
                pl.BlockSpec((1, C), lambda i: (0, 0)),    # bias: resident in VMEM
            ],
            out_specs=pl.BlockSpec((tm, C), lambda i: (i, 0)),  # compact, no lane padding
        ),
        compiler_params=pltpu.CompilerParams(
            dimension_semantics=("parallel",),   # megacore sharding of row-tiles (v7x)
            vmem_limit_bytes=budget,
        ),
        cost_estimate=cost,
    )(x2d, wt, b2d)

    return out.reshape(B, T, C)


if __name__ == "__main__":
    # Small synthetic config consistent with the module:
    #   opt.Prediction = 'CTC'/'Linear', opt.hidden_size = 32, opt.num_class = 16
    B, T, H, C = 2, 8, 32, 16

    key = jax.random.PRNGKey(0)
    kx, kw, kb = jax.random.split(key, 3)

    x = jax.random.normal(kx, (B, T, H), dtype=jnp.float32)

    # Deterministic nn.Linear-style init: U(-1/sqrt(H), 1/sqrt(H))
    bound = 1.0 / (H ** 0.5)
    weight = jax.random.uniform(kw, (C, H), jnp.float32, -bound, bound)
    bias = jax.random.uniform(kb, (C,), jnp.float32, -bound, bound)

    # Plain-JAX reference of the nn.Linear semantics.
    ref = jnp.einsum("bth,ch->btc", x, weight) + bias

    # --- Default fast path: bf16 streams, f32 MXU accumulation + f32 epilogue. ---
    wt_bf16, b_f32 = prepare_head_params(weight, bias)  # bf16 weight, f32 bias
    y_bf16 = jax.block_until_ready(head_forward(x, wt_bf16, b_f32))
    assert y_bf16.shape == (B, T, C)
    assert jnp.allclose(y_bf16, ref, atol=5e-2, rtol=5e-2)

    # --- Strict-parity path: everything f32. ---
    wt_f32, b_f32b = prepare_head_params(weight, bias, param_dtype=jnp.float32)
    y_f32 = jax.block_until_ready(head_forward(x, wt_f32, b_f32b))
    assert y_f32.shape == (B, T, C)
    assert jnp.allclose(y_f32, ref, atol=1e-5, rtol=1e-5)

    print("KERNEL_OK")
</pallas_src>

<mosaic_0001>
module attributes {stable_mosaic.version = 11 : i64} {
  func.func @_linear_head_kernel(%arg0: i32, %arg1: memref<16x32xbf16, #tpu.memory_space<vmem>>, %arg2: memref<32x16xbf16, #tpu.memory_space<vmem>>, %arg3: memref<1x16xf32, #tpu.memory_space<vmem>>, %arg4: memref<16x16xf32, #tpu.memory_space<vmem>>) attributes {dimension_semantics = [#tpu.dimension_semantics<parallel>], iteration_bounds = array<i64: 1>, scalar_prefetch = 0 : i64, scratch_operands = 0 : i64, tpu.core_type = #tpu.core_type<tc>, window_params = [{transform_indices = @transform_0, window_bounds = array<i64: 16, 32>}, {pipeline_mode = #tpu.pipeline_mode<synchronous>, transform_indices = @transform_1, window_bounds = array<i64: 32, 16>}, {pipeline_mode = #tpu.pipeline_mode<synchronous>, transform_indices = @transform_2, window_bounds = array<i64: 1, 16>}, {transform_indices = @transform_3, window_bounds = array<i64: 16, 16>}]} {
    %c0 = arith.constant 0 : index
    %c0_0 = arith.constant 0 : index
    %0 = vector.load %arg1[%c0, %c0_0] : memref<16x32xbf16, #tpu.memory_space<vmem>>, vector<16x32xbf16>
    %c0_1 = arith.constant 0 : index
    %c0_2 = arith.constant 0 : index
    %1 = vector.load %arg2[%c0_1, %c0_2] : memref<32x16xbf16, #tpu.memory_space<vmem>>, vector<32x16xbf16>
    %cst = arith.constant dense<0.000000e+00> : vector<16x16xf32>
    %2 = tpu.matmul %0, %1, %cst {dimension_numbers = #tpu.dot_dimension_numbers<[1], [0], [0], [1], [0, 0, 1, 1], [], []>} : vector<16x32xbf16>, vector<32x16xbf16>, vector<16x16xf32> -> vector<16x16xf32>
    %c0_3 = arith.constant 0 : index
    %c0_4 = arith.constant 0 : index
    %3 = vector.load %arg3[%c0_3, %c0_4] : memref<1x16xf32, #tpu.memory_space<vmem>>, vector<1x16xf32>
    %4 = vector.broadcast %3 : vector<1x16xf32> to vector<16x16xf32>
    %5 = arith.addf %2, %4 : vector<16x16xf32>
    %c0_5 = arith.constant 0 : index
    %c0_6 = arith.constant 0 : index
    %6 = vector.load %arg4[%c0_5, %c0_6] : memref<16x16xf32, #tpu.memory_space<vmem>>, vector<16x16xf32>
    tpu.vector_store %arg4[%c0_5, %c0_6], %5 {strides = array<i32>} : memref<16x16xf32, #tpu.memory_space<vmem>>, vector<16x16xf32>,
    return
  }
  func.func @transform_0(%arg0: i32) -> (i32, i32) {
    %c0_i32 = arith.constant 0 : i32
    %c0_i32_0 = arith.constant 0 : i32
    return %arg0, %c0_i32 : i32, i32
  }
  func.func @transform_1(%arg0: i32) -> (i32, i32) {
    %c0_i32 = arith.constant 0 : i32
    %c0_i32_0 = arith.constant 0 : i32
    %c0_i32_1 = arith.constant 0 : i32
    return %c0_i32, %c0_i32_0 : i32, i32
  }
  func.func @transform_2(%arg0: i32) -> (i32, i32) {
    %c0_i32 = arith.constant 0 : i32
    %c0_i32_0 = arith.constant 0 : i32
    %c0_i32_1 = arith.constant 0 : i32
    return %c0_i32, %c0_i32_0 : i32, i32
  }
  func.func @transform_3(%arg0: i32) -> (i32, i32) {
    %c0_i32 = arith.constant 0 : i32
    %c0_i32_0 = arith.constant 0 : i32
    return %arg0, %c0_i32 : i32, i32
  }
}

</mosaic_0001>

<bundles_post_ra>
// kernel: tpu_custom_call.1
= control target key start
LH: loop header
LB: loop body
LE: loop exit
PB: predicated region body
PF: predicated region fallthrough
CT: control target
= control target key end

     0   :  { %s166_s0 = inlined_call_operand.vmem [shape: bf16[16,32], index: 0, kind: input, shape index: {}]   ;;  %s167_s1 = inlined_call_operand.vmem [shape: bf16[32,16], index: 1, kind: input, shape index: {}]   ;;  %s168_s2 = inlined_call_operand.vmem [shape: f32[1,16], index: 2, kind: input, shape index: {}]   ;;  %s169_s3 = inlined_call_operand.hbm [shape: f32[16,16], index: 3, kind: output, shape index: {}]  }
   0x1   :  { %v97_v0 = vld [vmem:[%s167_s1 + $0x8] sm:$0xff] }
   0x2   :  { %8 = vsyncpa [#allocation3], 0  ;;  %53 = vmatpush.bf16.msra.mxu0 %v97_v0  ;;  %v96_v1 = vld [vmem:[%s167_s1] sm:$0xff]  ;;  %vm43_vm0 = vcmask 261120   ;;  %vm61_vm1 = vcmask 130048   ;;  %s128_s20 = smov [#allocation2]  }
   0x3   :  { %v95_v2 = vld [vmem:[%s166_s0] sm:$0xff]  ;;  %s68_s21 = sshll.u32 %s128_s20, 4  ;;  %s70_s1 = sshll.u32 %s169_s3, 4  ;;  %s69_s21 = int_to_ptr.vmem [resolvable:$true] %s68_s21  ;;  %s71_s1 = int_to_ptr.hbm [resolvable:$true] %s70_s1 }
   0x4   :  { %v101_v3 = vld [vmem:[%s168_s2] ss:$0 sm:$0xff]  ;;  %s129_s0 = smov 128   ;;  %s130_s24 = smov 8  }
   0x6   :  { %54 = vmatpush.bf16.msra.mxu0 %v96_v1 }
   0x9   :  { %94 = vmatmul.msk.bf16.vlgmr.msra.gmra.mxu0 %vm43_vm0, %v95_v2 }
  0x86   :  { %v56_v4 = vpop.f32.mrf.mxu0 }
  0x87   :  { %v57_v5 = vadd.f32 %v101_v3, %v56_v4 }
  0x89   :  { %62 = vst.msk [vmem:[#allocation2] sm:$0xff] %vm61_vm1, %v57_v5 }
  0x8e   :  { %v58_v6 = vpop.f32.mrf.mxu0 }
  0x8f   :  { %v59_v7 = vadd.f32 %v101_v3, %v58_v6 }
  0x91   :  { %63 = vst.msk [vmem:[#allocation2 + $0x8] sm:$0xff] %vm61_vm1, %v59_v7 }
  0x92   :  { %76 = dma.vmem_to_hbm [thread:$0]  %s69_s21, 256, %s71_s1, [#allocation3], %s129_s0, %s129_s0, %s130_s24  }
  0x93   :  { %126 = dma.done.wait [#allocation3], 256  }
  0x94   :  { %127 = vsyncadd [#allocation3], 4294967040 }
  0x95   :  { %81 = vsyncpa [#allocation3], 1 }

</bundles_post_ra>
